<compile_context>
chip_gen: v5e
topology: v5e:2x2
jax: 0.10.0
libtpu: 0.0.40
codegen_flags: <defaults>
</compile_context>

<pallas_src>
import jax
import jax.numpy as jnp
from jax.experimental import pallas as pl
from jax.experimental.pallas import tpu as pltpu

_LANE = 128


def _round_up(x, m):
    return (x + m - 1) // m * m


def _leaky_relu(v, slope=0.01):
    return jnp.where(v > 0, v, slope * v)


def flatdense_kernel(x_ref, w1_ref, b1_ref, w2_ref, b2_ref,
                     w3_ref, b3_ref, w4_ref, b4_ref, o_ref):
    # Layer 1 in f32 (K is tiny, so this hides behind the x DMA); layers 2-4 use
    # bf16 MXU operands with f32 accumulation.  Elementwise math stays f32 (VPU).
    h = jnp.dot(x_ref[...], w1_ref[...], preferred_element_type=jnp.float32)
    h = _leaky_relu(h + b1_ref[...])
    h = jnp.dot(h.astype(jnp.bfloat16), w2_ref[...],
                preferred_element_type=jnp.float32)
    h = _leaky_relu(h + b2_ref[...])
    h = jnp.dot(h.astype(jnp.bfloat16), w3_ref[...],
                preferred_element_type=jnp.float32)
    h = _leaky_relu(h + b3_ref[...])
    out = jnp.dot(h.astype(jnp.bfloat16), w4_ref[...],
                  preferred_element_type=jnp.float32) + b4_ref[...]
    o_ref[...] = out.astype(o_ref.dtype)   # bf16, 128-lane-dense unmasked store


def _pad2d(a, rows, cols):
    return jnp.pad(a, ((0, rows - a.shape[0]), (0, cols - a.shape[1])))


def prepare_params(params):
    """Pad + convert weights/biases ONCE (lane-dense, MXU dtypes).

    Call outside the per-step forward so the pads/casts are not re-run per call.
    Padded rows/cols/bias lanes are zero, so padded lanes stay exactly 0 through
    leaky_relu and never contaminate real outputs.
    """
    (w1, b1), (w2, b2), (w3, b3), (w4, b4) = params
    K = w1.shape[0]
    n_actions = w4.shape[1]
    K_pad = _round_up(K, _LANE)
    H_pad = _LANE                                # hidden widths 32/64 -> 128 lanes
    N_pad = _round_up(n_actions, _LANE)
    return dict(
        K=K, K_pad=K_pad, n_actions=n_actions, N_pad=N_pad,
        w1=_pad2d(w1, K_pad, H_pad).astype(jnp.float32),   # layer 1 stays f32
        b1=_pad2d(b1, 1, H_pad).astype(jnp.float32),
        w2=_pad2d(w2, H_pad, H_pad).astype(jnp.bfloat16),
        b2=_pad2d(b2, 1, H_pad).astype(jnp.float32),
        w3=_pad2d(w3, H_pad, H_pad).astype(jnp.bfloat16),
        b3=_pad2d(b3, 1, H_pad).astype(jnp.float32),
        w4=_pad2d(w4, H_pad, N_pad).astype(jnp.bfloat16),
        b4=_pad2d(b4, 1, N_pad).astype(jnp.float32),
    )


def flatdense_forward(image, features, prepared):
    """image: (B, H, W) f32; features unused (matches FlatDense.forward).
    Eval-mode dropout = identity."""
    del features  # unused by FlatDense.forward
    B = image.shape[0]
    x = image.reshape(B, -1).astype(jnp.float32)   # torch.flatten(image, 1)
    K, K_pad = prepared["K"], prepared["K_pad"]
    n_actions, N_pad = prepared["n_actions"], prepared["N_pad"]
    assert x.shape[1] == K

    # Contraction dim must be explicitly zero-padded when ragged (never leave the
    # K dim to edge-block garbage: garbage * zero-padded weight rows could be NaN).
    # For H*W = 256 this is a no-op and x goes straight in with no extra HBM pass.
    if K_pad != K:
        x = jnp.pad(x, ((0, 0), (0, K_pad - K)))

    # Batch tile: large tiles amortize per-step pipeline overhead; cap at
    # ceil(B/2) so the grid has >=2 steps whenever B allows (v7x: both TCs busy).
    if B <= 16:
        tm = B                                       # single full-array block
    else:
        tm = min(1024, _round_up(pl.cdiv(B, 2), 16))  # 16: bf16 out sublane pack
    grid = (pl.cdiv(B, tm),)                          # ragged last block, no B pad

    def resident(a):
        # Constant block index -> fetched once, VMEM-resident across grid steps.
        return pl.BlockSpec(a.shape, lambda i: (0, 0))

    out_p = pl.pallas_call(
        flatdense_kernel,
        out_shape=jax.ShapeDtypeStruct((B, N_pad), jnp.bfloat16),
        grid=grid,
        in_specs=[pl.BlockSpec((tm, K_pad), lambda i: (i, 0)),
                  resident(prepared["w1"]), resident(prepared["b1"]),
                  resident(prepared["w2"]), resident(prepared["b2"]),
                  resident(prepared["w3"]), resident(prepared["b3"]),
                  resident(prepared["w4"]), resident(prepared["b4"])],
        out_specs=pl.BlockSpec((tm, N_pad), lambda i: (i, 0)),
        compiler_params=pltpu.CompilerParams(
            dimension_semantics=("parallel",)),       # batch axis -> both v7x TCs
    )(x, prepared["w1"], prepared["b1"], prepared["w2"], prepared["b2"],
      prepared["w3"], prepared["b3"], prepared["w4"], prepared["b4"])

    return out_p[:, :n_actions].astype(jnp.float32)


def init_params(key, height, width, n_actions):
    """Deterministic init mirroring the layer shapes of FlatDense.__init__."""
    dims = [(height * width, 32), (32, 64), (64, 64), (64, n_actions)]
    params = []
    for i, (fan_in, fan_out) in enumerate(dims):
        kw, kb, key = jax.random.split(jax.random.fold_in(key, i), 3)
        bound = 1.0 / jnp.sqrt(fan_in)  # matches nn.Linear default bound
        w = jax.random.uniform(kw, (fan_in, fan_out), jnp.float32, -bound, bound)
        b = jax.random.uniform(kb, (1, fan_out), jnp.float32, -bound, bound)
        params.append((w, b))
    return params


if __name__ == "__main__":
    B, H, W = 2, 16, 16
    dim_features = 4   # unused by the network (as in the reference module)
    n_actions = 4

    key = jax.random.PRNGKey(0)
    k_img, k_feat, k_par = jax.random.split(key, 3)
    image = jax.random.normal(k_img, (B, H, W), jnp.float32)
    features = jax.random.normal(k_feat, (B, dim_features), jnp.float32)
    params = init_params(k_par, H, W, n_actions)

    prepared = prepare_params(params)               # pad/convert once, reused
    out = flatdense_forward(image, features, prepared)
    out = jax.block_until_ready(out)

    # Plain-JAX reference mirroring the kernel numerics (layer 1 f32, layers 2-4
    # bf16 operands / f32 accum, eval-mode dropout = identity, bf16 output).
    (w1, b1), (w2, b2), (w3, b3), (w4, b4) = params
    ref = image.reshape(B, -1).astype(jnp.float32)
    ref = jnp.dot(ref, w1, preferred_element_type=jnp.float32) + b1
    ref = jnp.where(ref > 0, ref, 0.01 * ref)
    for (w, b) in ((w2, b2), (w3, b3)):
        ref = jnp.dot(ref.astype(jnp.bfloat16), w.astype(jnp.bfloat16),
                      preferred_element_type=jnp.float32) + b
        ref = jnp.where(ref > 0, ref, 0.01 * ref)
    ref = jnp.dot(ref.astype(jnp.bfloat16), w4.astype(jnp.bfloat16),
                  preferred_element_type=jnp.float32) + b4
    ref = ref.astype(jnp.bfloat16).astype(jnp.float32)   # kernel emits bf16

    assert out.shape == (B, n_actions)
    assert jnp.allclose(out, ref, atol=1e-2, rtol=1e-2)

    print("KERNEL_OK")
</pallas_src>

<mosaic_0001>
module attributes {stable_mosaic.version = 11 : i64} {
  func.func @flatdense_kernel(%arg0: i32, %arg1: memref<2x256xf32, #tpu.memory_space<vmem>>, %arg2: memref<256x128xf32, #tpu.memory_space<vmem>>, %arg3: memref<1x128xf32, #tpu.memory_space<vmem>>, %arg4: memref<128x128xbf16, #tpu.memory_space<vmem>>, %arg5: memref<1x128xf32, #tpu.memory_space<vmem>>, %arg6: memref<128x128xbf16, #tpu.memory_space<vmem>>, %arg7: memref<1x128xf32, #tpu.memory_space<vmem>>, %arg8: memref<128x128xbf16, #tpu.memory_space<vmem>>, %arg9: memref<1x128xf32, #tpu.memory_space<vmem>>, %arg10: memref<2x128xbf16, #tpu.memory_space<vmem>>) attributes {dimension_semantics = [#tpu.dimension_semantics<parallel>], iteration_bounds = array<i64: 1>, scalar_prefetch = 0 : i64, scratch_operands = 0 : i64, tpu.core_type = #tpu.core_type<tc>, window_params = [{transform_indices = @transform_0, window_bounds = array<i64: 2, 256>}, {pipeline_mode = #tpu.pipeline_mode<synchronous>, transform_indices = @transform_1, window_bounds = array<i64: 256, 128>}, {pipeline_mode = #tpu.pipeline_mode<synchronous>, transform_indices = @transform_2, window_bounds = array<i64: 1, 128>}, {pipeline_mode = #tpu.pipeline_mode<synchronous>, transform_indices = @transform_3, window_bounds = array<i64: 128, 128>}, {pipeline_mode = #tpu.pipeline_mode<synchronous>, transform_indices = @transform_4, window_bounds = array<i64: 1, 128>}, {pipeline_mode = #tpu.pipeline_mode<synchronous>, transform_indices = @transform_5, window_bounds = array<i64: 128, 128>}, {pipeline_mode = #tpu.pipeline_mode<synchronous>, transform_indices = @transform_6, window_bounds = array<i64: 1, 128>}, {pipeline_mode = #tpu.pipeline_mode<synchronous>, transform_indices = @transform_7, window_bounds = array<i64: 128, 128>}, {pipeline_mode = #tpu.pipeline_mode<synchronous>, transform_indices = @transform_8, window_bounds = array<i64: 1, 128>}, {transform_indices = @transform_9, window_bounds = array<i64: 2, 128>}]} {
    %c0 = arith.constant 0 : index
    %c0_0 = arith.constant 0 : index
    %0 = vector.load %arg1[%c0, %c0_0] : memref<2x256xf32, #tpu.memory_space<vmem>>, vector<2x256xf32>
    %c0_1 = arith.constant 0 : index
    %c0_2 = arith.constant 0 : index
    %1 = vector.load %arg2[%c0_1, %c0_2] : memref<256x128xf32, #tpu.memory_space<vmem>>, vector<256x128xf32>
    %cst = arith.constant dense<0.000000e+00> : vector<2x128xf32>
    %2 = tpu.matmul %0, %1, %cst {dimension_numbers = #tpu.dot_dimension_numbers<[1], [0], [0], [1], [0, 0, 1, 1], [], []>} : vector<2x256xf32>, vector<256x128xf32>, vector<2x128xf32> -> vector<2x128xf32>
    %c0_3 = arith.constant 0 : index
    %c0_4 = arith.constant 0 : index
    %3 = vector.load %arg3[%c0_3, %c0_4] : memref<1x128xf32, #tpu.memory_space<vmem>>, vector<1x128xf32>
    %4 = vector.broadcast %3 : vector<1x128xf32> to vector<2x128xf32>
    %5 = arith.addf %2, %4 : vector<2x128xf32>
    %cst_5 = arith.constant 0.000000e+00 : f32
    %6 = vector.broadcast %cst_5 : f32 to vector<2x128xf32>
    %7 = arith.cmpf ogt, %5, %6 : vector<2x128xf32>
    %cst_6 = arith.constant 0.00999999977 : f32
    %8 = vector.broadcast %cst_6 : f32 to vector<2x128xf32>
    %9 = arith.mulf %8, %5 : vector<2x128xf32>
    %10 = arith.select %7, %5, %9 : vector<2x128xi1>, vector<2x128xf32>
    %11 = arith.truncf %10 : vector<2x128xf32> to vector<2x128xbf16>
    %c0_7 = arith.constant 0 : index
    %c0_8 = arith.constant 0 : index
    %12 = vector.load %arg4[%c0_7, %c0_8] : memref<128x128xbf16, #tpu.memory_space<vmem>>, vector<128x128xbf16>
    %cst_9 = arith.constant dense<0.000000e+00> : vector<2x128xf32>
    %13 = tpu.matmul %11, %12, %cst_9 {dimension_numbers = #tpu.dot_dimension_numbers<[1], [0], [0], [1], [0, 0, 1, 1], [], []>} : vector<2x128xbf16>, vector<128x128xbf16>, vector<2x128xf32> -> vector<2x128xf32>
    %c0_10 = arith.constant 0 : index
    %c0_11 = arith.constant 0 : index
    %14 = vector.load %arg5[%c0_10, %c0_11] : memref<1x128xf32, #tpu.memory_space<vmem>>, vector<1x128xf32>
    %15 = vector.broadcast %14 : vector<1x128xf32> to vector<2x128xf32>
    %16 = arith.addf %13, %15 : vector<2x128xf32>
    %cst_12 = arith.constant 0.000000e+00 : f32
    %17 = vector.broadcast %cst_12 : f32 to vector<2x128xf32>
    %18 = arith.cmpf ogt, %16, %17 : vector<2x128xf32>
    %cst_13 = arith.constant 0.00999999977 : f32
    %19 = vector.broadcast %cst_13 : f32 to vector<2x128xf32>
    %20 = arith.mulf %19, %16 : vector<2x128xf32>
    %21 = arith.select %18, %16, %20 : vector<2x128xi1>, vector<2x128xf32>
    %22 = arith.truncf %21 : vector<2x128xf32> to vector<2x128xbf16>
    %c0_14 = arith.constant 0 : index
    %c0_15 = arith.constant 0 : index
    %23 = vector.load %arg6[%c0_14, %c0_15] : memref<128x128xbf16, #tpu.memory_space<vmem>>, vector<128x128xbf16>
    %cst_16 = arith.constant dense<0.000000e+00> : vector<2x128xf32>
    %24 = tpu.matmul %22, %23, %cst_16 {dimension_numbers = #tpu.dot_dimension_numbers<[1], [0], [0], [1], [0, 0, 1, 1], [], []>} : vector<2x128xbf16>, vector<128x128xbf16>, vector<2x128xf32> -> vector<2x128xf32>
    %c0_17 = arith.constant 0 : index
    %c0_18 = arith.constant 0 : index
    %25 = vector.load %arg7[%c0_17, %c0_18] : memref<1x128xf32, #tpu.memory_space<vmem>>, vector<1x128xf32>
    %26 = vector.broadcast %25 : vector<1x128xf32> to vector<2x128xf32>
    %27 = arith.addf %24, %26 : vector<2x128xf32>
    %cst_19 = arith.constant 0.000000e+00 : f32
    %28 = vector.broadcast %cst_19 : f32 to vector<2x128xf32>
    %29 = arith.cmpf ogt, %27, %28 : vector<2x128xf32>
    %cst_20 = arith.constant 0.00999999977 : f32
    %30 = vector.broadcast %cst_20 : f32 to vector<2x128xf32>
    %31 = arith.mulf %30, %27 : vector<2x128xf32>
    %32 = arith.select %29, %27, %31 : vector<2x128xi1>, vector<2x128xf32>
    %33 = arith.truncf %32 : vector<2x128xf32> to vector<2x128xbf16>
    %c0_21 = arith.constant 0 : index
    %c0_22 = arith.constant 0 : index
    %34 = vector.load %arg8[%c0_21, %c0_22] : memref<128x128xbf16, #tpu.memory_space<vmem>>, vector<128x128xbf16>
    %cst_23 = arith.constant dense<0.000000e+00> : vector<2x128xf32>
    %35 = tpu.matmul %33, %34, %cst_23 {dimension_numbers = #tpu.dot_dimension_numbers<[1], [0], [0], [1], [0, 0, 1, 1], [], []>} : vector<2x128xbf16>, vector<128x128xbf16>, vector<2x128xf32> -> vector<2x128xf32>
    %c0_24 = arith.constant 0 : index
    %c0_25 = arith.constant 0 : index
    %36 = vector.load %arg9[%c0_24, %c0_25] : memref<1x128xf32, #tpu.memory_space<vmem>>, vector<1x128xf32>
    %37 = vector.broadcast %36 : vector<1x128xf32> to vector<2x128xf32>
    %38 = arith.addf %35, %37 : vector<2x128xf32>
    %39 = arith.truncf %38 : vector<2x128xf32> to vector<2x128xbf16>
    %c0_26 = arith.constant 0 : index
    %c0_27 = arith.constant 0 : index
    %40 = vector.load %arg10[%c0_26, %c0_27] : memref<2x128xbf16, #tpu.memory_space<vmem>>, vector<2x128xbf16>
    tpu.vector_store %arg10[%c0_26, %c0_27], %39 {strides = array<i32>} : memref<2x128xbf16, #tpu.memory_space<vmem>>, vector<2x128xbf16>,
    return
  }
  func.func @transform_0(%arg0: i32) -> (i32, i32) {
    %c0_i32 = arith.constant 0 : i32
    %c0_i32_0 = arith.constant 0 : i32
    return %arg0, %c0_i32 : i32, i32
  }
  func.func @transform_1(%arg0: i32) -> (i32, i32) {
    %c0_i32 = arith.constant 0 : i32
    %c0_i32_0 = arith.constant 0 : i32
    %c0_i32_1 = arith.constant 0 : i32
    return %c0_i32, %c0_i32_0 : i32, i32
  }
  func.func @transform_2(%arg0: i32) -> (i32, i32) {
    %c0_i32 = arith.constant 0 : i32
    %c0_i32_0 = arith.constant 0 : i32
    %c0_i32_1 = arith.constant 0 : i32
    return %c0_i32, %c0_i32_0 : i32, i32
  }
  func.func @transform_3(%arg0: i32) -> (i32, i32) {
    %c0_i32 = arith.constant 0 : i32
    %c0_i32_0 = arith.constant 0 : i32
    %c0_i32_1 = arith.constant 0 : i32
    return %c0_i32, %c0_i32_0 : i32, i32
  }
  func.func @transform_4(%arg0: i32) -> (i32, i32) {
    %c0_i32 = arith.constant 0 : i32
    %c0_i32_0 = arith.constant 0 : i32
    %c0_i32_1 = arith.constant 0 : i32
    return %c0_i32, %c0_i32_0 : i32, i32
  }
  func.func @transform_5(%arg0: i32) -> (i32, i32) {
    %c0_i32 = arith.constant 0 : i32
    %c0_i32_0 = arith.constant 0 : i32
    %c0_i32_1 = arith.constant 0 : i32
    return %c0_i32, %c0_i32_0 : i32, i32
  }
  func.func @transform_6(%arg0: i32) -> (i32, i32) {
    %c0_i32 = arith.constant 0 : i32
    %c0_i32_0 = arith.constant 0 : i32
    %c0_i32_1 = arith.constant 0 : i32
    return %c0_i32, %c0_i32_0 : i32, i32
  }
  func.func @transform_7(%arg0: i32) -> (i32, i32) {
    %c0_i32 = arith.constant 0 : i32
    %c0_i32_0 = arith.constant 0 : i32
    %c0_i32_1 = arith.constant 0 : i32
    return %c0_i32, %c0_i32_0 : i32, i32
  }
  func.func @transform_8(%arg0: i32) -> (i32, i32) {
    %c0_i32 = arith.constant 0 : i32
    %c0_i32_0 = arith.constant 0 : i32
    %c0_i32_1 = arith.constant 0 : i32
    return %c0_i32, %c0_i32_0 : i32, i32
  }
  func.func @transform_9(%arg0: i32) -> (i32, i32) {
    %c0_i32 = arith.constant 0 : i32
    %c0_i32_0 = arith.constant 0 : i32
    return %arg0, %c0_i32 : i32, i32
  }
}

</mosaic_0001>

<bundles_post_ra>
// kernel: tpu_custom_call.1
= control target key start
LH: loop header
LB: loop body
LE: loop exit
PB: predicated region body
PF: predicated region fallthrough
CT: control target
= control target key end

     0   :  { %14 = vsyncpa [#allocation3], 0  ;;  %s844_s0 = inlined_call_operand.hbm [shape: f32[2,256], index: 0, kind: input, shape index: {}]   ;;  %s845_s1 = inlined_call_operand.hbm [shape: f32[256,128], index: 1, kind: input, shape index: {}]   ;;  %s846_s2 = inlined_call_operand.vmem [shape: f32[1,128], index: 2, kind: input, shape index: {}]   ;;  %s847_s3 = inlined_call_operand.hbm [shape: bf16[128,128], index: 3, kind: input, shape index: {}]   ;;  %s848_s4 = inlined_call_operand.vmem [shape: f32[1,128], index: 4, kind: input, shape index: {}]   ;;  %s849_s5 = inlined_call_operand.hbm [shape: bf16[128,128], index: 5, kind: input, shape index: {}]   ;;  %s850_s6 = inlined_call_operand.vmem [shape: f32[1,128], index: 6, kind: input, shape index: {}]   ;;  %s851_s7 = inlined_call_operand.hbm [shape: bf16[128,128], index: 7, kind: input, shape index: {}]   ;;  %s852_s8 = inlined_call_operand.vmem [shape: f32[1,128], index: 8, kind: input, shape index: {}]   ;;  %s853_s9 = inlined_call_operand.hbm [shape: bf16[2,128], index: 9, kind: output, shape index: {}]  }
   0x1   :  { %15 = vsyncpa [#allocation6], 0 }
   0x2   :  { %16 = vsyncpa [#allocation9], 0  ;;  %s33_s11 = sshll.u32 %s845_s1, 4  ;;  %s34_s11 = int_to_ptr.hbm [resolvable:$true] %s33_s11 }
   0x3   :  { %17 = vsyncpa [#allocation4], 0  ;;  %s754_s12 = smov [#allocation5]   ;;  %s755_s14 = smov 128  }
   0x4   :  { %s35_s13 = sshll.u32 %s754_s12, 4  ;;  %s756_s15 = smov 8   ;;  %s36_s13 = int_to_ptr.vmem [resolvable:$true] %s35_s13 }
   0x5   :  { %41 = dma.hbm_to_vmem [thread:$0]  %s34_s11, 4096, %s36_s13, [#allocation6], %s755_s14, %s755_s14, %s756_s15  }
   0x6   :  { %s63_s18 = sshll.u32 %s849_s5, 4  ;;  %s757_s19 = smov [#allocation8]   ;;  %s64_s18 = int_to_ptr.hbm [resolvable:$true] %s63_s18 }
   0x7   :  { %s65_s20 = sshll.u32 %s757_s19, 4  ;;  %s23_s23 = sshll.u32 %s844_s0, 4  ;;  %s66_s20 = int_to_ptr.vmem [resolvable:$true] %s65_s20  ;;  %s24_s23 = int_to_ptr.hbm [resolvable:$true] %s23_s23 }
   0x8   :  { %s758_s1 = smov 64   ;;  %s759_s24 = smov 4  }
   0x9   :  { %71 = dma.hbm_to_vmem [thread:$0]  %s64_s18, 1024, %s66_s20, [#allocation9], %s758_s1, %s758_s1, %s759_s24  }
   0xa   :  { %s48_s27 = sshll.u32 %s847_s3, 4  ;;  %s760_s28 = smov [#allocation2]   ;;  %s49_s27 = int_to_ptr.hbm [resolvable:$true] %s48_s27 }
   0xb   :  { %s25_s29 = sshll.u32 %s760_s28, 4  ;;  %s761_s5 = smov [#allocation7]   ;;  %s26_s29 = int_to_ptr.vmem [resolvable:$true] %s25_s29 }
   0xc   :  { %28 = dma.hbm_to_vmem [thread:$0]  %s24_s23, 64, %s26_s29, [#allocation3]  }
   0xd   :  { %s50_s30 = sshll.u32 %s761_s5, 4  ;;  %s78_s0 = sshll.u32 %s851_s7, 4  ;;  %s51_s30 = int_to_ptr.vmem [resolvable:$true] %s50_s30  ;;  %s79_s0 = int_to_ptr.hbm [resolvable:$true] %s78_s0 }
   0xe   :  { %56 = dma.hbm_to_vmem [thread:$0]  %s49_s27, 1024, %s51_s30, [#allocation6], %s758_s1, %s758_s1, %s759_s24  }
   0xf   :  { %s762_s12 = smov [#allocation10]  }
  0x10   :  { %s80_s13 = sshll.u32 %s762_s12, 4  ;;  %s81_s13 = int_to_ptr.vmem [resolvable:$true] %s80_s13 }
  0x11   :  { %86 = dma.hbm_to_vmem [thread:$0]  %s79_s0, 1024, %s81_s13, [#allocation9], %s758_s1, %s758_s1, %s759_s24  }
  0x12   :  { %746 = dma.done.wait [#allocation3], 64  }
  0x13   :  { %747 = vsyncadd [#allocation3], 4294967232 }
  0x14   :  { %748 = dma.done.wait [#allocation6], 5120  }
  0x15   :  { %749 = vsyncadd [#allocation6], 4294962176 }
  0x16   :  { %750 = dma.done.wait [#allocation9], 2048  }
  0x17   :  { %751 = vsyncadd [#allocation9], 4294965248  ;;  %v125_v0 = vld [vmem:[#allocation5 + $0x78] sm:$0xff]  ;;  %v124_v1 = vld [vmem:[#allocation5 + $0x70] sm:$0xff]  ;;  %s763_s18 = smov [#allocation11]   ;;  %s456_s22 = sshll.u32 %s853_s9, 4  ;;  %s457_s22 = int_to_ptr.hbm [resolvable:$true] %s456_s22 }
  0x18   :  { %152 = vmatpush.msra.mxu1 %v125_v0  ;;  %v123_v2 = vld [vmem:[#allocation5 + $0x68] sm:$0xff]  ;;  %v122_v3 = vld [vmem:[#allocation5 + $0x60] sm:$0xff]  ;;  %v121_v4 = vld [vmem:[#allocation5 + $0x58] sm:$0xff]  ;;  %s454_s19 = sshll.u32 %s763_s18, 4  ;;  %s455_s19 = int_to_ptr.vmem [resolvable:$true] %s454_s19 }
  0x19   :  { %v120_v5 = vld [vmem:[#allocation5 + $0x50] sm:$0xff]  ;;  %v119_v6 = vld [vmem:[#allocation5 + $0x48] sm:$0xff]  ;;  %v118_v7 = vld [vmem:[#allocation5 + $0x40] sm:$0xff] }
  0x1a   :  { %153 = vmatpush.msra.mxu1 %v124_v1  ;;  %v117_v8 = vld [vmem:[#allocation5 + $0x38] sm:$0xff]  ;;  %v116_v10 = vld [vmem:[#allocation5 + $0x30] sm:$0xff]  ;;  %v115_v11 = vld [vmem:[#allocation5 + $0x28] sm:$0xff] }
  0x1b   :  { %v109_v9 = vld [vmem:[#allocation2] sm:$0xf]  ;;  %v114_v12 = vld [vmem:[#allocation5 + $0x20] sm:$0xff]  ;;  %v112_v14 = vld [vmem:[#allocation5 + $0x10] sm:$0xff] }
  0x1c   :  { %154 = vmatpush.msra.mxu1 %v123_v2  ;;  %147 = vst [vmem:[#allocation1] ss:$4 sm:$0xff] %v109_v9  ;;  %v113_v13 = vld [vmem:[#allocation5 + $0x18] sm:$0xff]  ;;  %v111_v15 = vld [vmem:[#allocation5 + $0x8] sm:$0xff]  ;;  %v110_v16 = vld [vmem:[#allocation5] sm:$0xff] }
  0x1d   :  { %v141_v17 = vld [vmem:[#allocation5 + $0xf8] sm:$0xff]  ;;  %v140_v19 = vld [vmem:[#allocation5 + $0xf0] sm:$0xff]  ;;  %v139_v21 = vld [vmem:[#allocation5 + $0xe8] sm:$0xff] }
  0x1e   :  { %155 = vmatpush.msra.mxu1 %v122_v3  ;;  %v571_v20 = vld [vmem:[#allocation7 + $0x38] sm:$0xff]  ;;  %v570_v22 = vld [vmem:[#allocation7 + $0x30] sm:$0xff]  ;;  %v138_v23 = vld [vmem:[#allocation5 + $0xe0] sm:$0xff] }
  0x1f   :  { %264 = vmatpush.bf16.msra.mxu2 %v571_v20  ;;  %v137_v24 = vld [vmem:[#allocation5 + $0xd8] sm:$0xff]  ;;  %v569_v25 = vld [vmem:[#allocation7 + $0x28] sm:$0xff]  ;;  %v136_v26 = vld [vmem:[#allocation5 + $0xd0] sm:$0xff] }
  0x20   :  { %156 = vmatpush.msra.mxu1 %v121_v4  ;;  %v135_v27 = vld [vmem:[#allocation5 + $0xc8] sm:$0xff]  ;;  %v568_v28 = vld [vmem:[#allocation7 + $0x20] sm:$0xff]  ;;  %v133_v30 = vld [vmem:[#allocation5 + $0xb8] sm:$0xff] }
  0x21   :  { %v134_v29 = vld [vmem:[#allocation5 + $0xc0] sm:$0xff]  ;;  %v132_v31 = vld [vmem:[#allocation5 + $0xb0] sm:$0xff]  ;;  %v131_v32 = vld [vmem:[#allocation5 + $0xa8] sm:$0xff] }
  0x22   :  { %157 = vmatpush.msra.mxu1 %v120_v5  ;;  %v130_v33 = vld [vmem:[#allocation5 + $0xa0] sm:$0xff]  ;;  %v129_v34 = vld [vmem:[#allocation5 + $0x98] sm:$0xff]  ;;  %v128_v35 = vld [vmem:[#allocation5 + $0x90] sm:$0xff] }
  0x23   :  { %v148_v18 = vld.sshfl [vmem:[#allocation1] sm:$0xff pattern:$0x73625140]  ;;  %265 = vmatpush.bf16.msra.mxu2 %v570_v22  ;;  %v127_v36 = vld [vmem:[#allocation5 + $0x88] sm:$0xff]  ;;  %v126_v37 = vld [vmem:[#allocation5 + $0x80] sm:$0xff] }
  0x24   :  { %158 = vmatpush.msra.mxu1 %v119_v6  ;;  %v149_v38 = vld.sshfl [vmem:[#allocation1 + $0x8] sm:$0xff pattern:$0x73625140]  ;;  %v566_v40 = vld [vmem:[#allocation7 + $0x10] sm:$0xff]  ;;  %v565_v41 = vld [vmem:[#allocation7 + $0x8] sm:$0xff] }
  0x25   :  { %v567_v39 = vld [vmem:[#allocation7 + $0x18] sm:$0xff]  ;;  %v564_v42 = vld [vmem:[#allocation7] sm:$0xff]  ;;  %v578_v44 = vld [vmem:[#allocation8 + $0x30] sm:$0xff] }
  0x26   :  { %159 = vmatpush.msra.mxu1 %v118_v7  ;;  %v579_v43 = vld [vmem:[#allocation8 + $0x38] sm:$0xff]  ;;  %v577_v45 = vld [vmem:[#allocation8 + $0x28] sm:$0xff]  ;;  %v576_v46 = vld [vmem:[#allocation8 + $0x20] sm:$0xff] }
  0x27   :  { %266 = vmatpush.bf16.msra.mxu2 %v569_v25  ;;  %349 = vmatpush.bf16.msra.mxu3 %v579_v43  ;;  %v575_v48 = vld [vmem:[#allocation8 + $0x18] sm:$0xff]  ;;  %v574_v49 = vld [vmem:[#allocation8 + $0x10] sm:$0xff]  ;;  %v573_v57 = vld [vmem:[#allocation8 + $0x8] sm:$0xff] }
  0x28   :  { %160 = vmatpush.msra.mxu1 %v117_v8  ;;  %v598_v50 = vld [vmem:[%s846_s2] ss:$0 sm:$0xff]  ;;  %v572_v58 = vld [vmem:[#allocation8] sm:$0xff]  ;;  %v587_v59 = vld [vmem:[#allocation10 + $0x38] sm:$0xff] }
  0x29   :  { %434 = vmatpush.bf16.msra.mxu0 %v587_v59  ;;  %v586_v60 = vld [vmem:[#allocation10 + $0x30] sm:$0xff]  ;;  %v585_v61 = vld [vmem:[#allocation10 + $0x28] sm:$0xff]  ;;  %v584_v62 = vld [vmem:[#allocation10 + $0x20] sm:$0xff] }
  0x2a   :  { %161 = vmatpush.msra.mxu1 %v116_v10  ;;  %v583_v63 = vld [vmem:[#allocation10 + $0x18] sm:$0xff]  ;;  %v582_v0 = vld [vmem:[#allocation10 + $0x10] sm:$0xff]  ;;  %v581_v8 = vld [vmem:[#allocation10 + $0x8] sm:$0xff] }
  0x2b   :  { %267 = vmatpush.bf16.msra.mxu2 %v568_v28  ;;  %350 = vmatpush.bf16.msra.mxu3 %v578_v44  ;;  %v599_v1 = vld [vmem:[%s848_s4] ss:$0 sm:$0xff]  ;;  %v580_v9 = vld [vmem:[#allocation10] sm:$0xff] }
  0x2c   :  { %162 = vmatpush.msra.mxu1 %v115_v11  ;;  %v600_v10 = vld [vmem:[%s850_s6] ss:$0 sm:$0xff] }
  0x2d   :  { %435 = vmatpush.bf16.msra.mxu0 %v586_v60 }
  0x2e   :  { %163 = vmatpush.msra.mxu1 %v114_v12 }
  0x2f   :  { %268 = vmatpush.bf16.msra.mxu2 %v567_v39  ;;  %351 = vmatpush.bf16.msra.mxu3 %v577_v45 }
  0x30   :  { %164 = vmatpush.msra.mxu1 %v113_v13 }
  0x31   :  { %436 = vmatpush.bf16.msra.mxu0 %v585_v61 }
  0x32   :  { %165 = vmatpush.msra.mxu1 %v112_v14 }
  0x33   :  { %269 = vmatpush.bf16.msra.mxu2 %v566_v40  ;;  %352 = vmatpush.bf16.msra.mxu3 %v576_v46 }
  0x34   :  { %166 = vmatpush.msra.mxu1 %v111_v15 }
  0x35   :  { %437 = vmatpush.bf16.msra.mxu0 %v584_v62 }
  0x36   :  { %167 = vmatpush.msra.mxu1 %v110_v16 }
  0x37   :  { %168 = vmatmul.f32.vlgmr.msra.gmra.mxu1 %v148_v18  ;;  %270 = vmatpush.bf16.msra.mxu2 %v565_v41 }
  0x38   :  { %172 = vmatpush.msrb.mxu1 %v141_v17  ;;  %353 = vmatpush.bf16.msra.mxu3 %v575_v48  ;;  %v601_v17 = vld [vmem:[%s852_s8] ss:$0 sm:$0xff] }
  0x39   :  { %438 = vmatpush.bf16.msra.mxu0 %v583_v63 }
  0x3a   :  { %173 = vmatpush.msrb.mxu1 %v140_v19 }
  0x3b   :  { %271 = vmatpush.bf16.msra.mxu2 %v564_v42 }
  0x3c   :  { %174 = vmatpush.msrb.mxu1 %v139_v21  ;;  %354 = vmatpush.bf16.msra.mxu3 %v574_v49 }
  0x3d   :  { %439 = vmatpush.bf16.msra.mxu0 %v582_v0 }
  0x3e   :  { %175 = vmatpush.msrb.mxu1 %v138_v23 }
  0x40   :  { %176 = vmatpush.msrb.mxu1 %v137_v24  ;;  %355 = vmatpush.bf16.msra.mxu3 %v573_v57 }
  0x41   :  { %440 = vmatpush.bf16.msra.mxu0 %v581_v8 }
  0x42   :  { %177 = vmatpush.msrb.mxu1 %v136_v26 }
  0x44   :  { %178 = vmatpush.msrb.mxu1 %v135_v27  ;;  %356 = vmatpush.bf16.msra.mxu3 %v572_v58 }
  0x45   :  { %441 = vmatpush.bf16.msra.mxu0 %v580_v9 }
  0x46   :  { %179 = vmatpush.msrb.mxu1 %v134_v29 }
  0x48   :  { %180 = vmatpush.msrb.mxu1 %v133_v30 }
  0x4a   :  { %181 = vmatpush.msrb.mxu1 %v132_v31 }
  0x4c   :  { %182 = vmatpush.msrb.mxu1 %v131_v32 }
  0x4e   :  { %183 = vmatpush.msrb.mxu1 %v130_v33 }
  0x50   :  { %184 = vmatpush.msrb.mxu1 %v129_v34 }
  0x52   :  { %185 = vmatpush.msrb.mxu1 %v128_v35 }
  0x54   :  { %186 = vmatpush.msrb.mxu1 %v127_v36 }
  0x56   :  { %187 = vmatpush.msrb.mxu1 %v126_v37 }
  0x57   :  { %188 = vmatmul.f32.vlgmr.msrb.gmra.mxu1 %v149_v38 }
  0xb4   :  { %v169_v47 = vpop.f32.mrf.mxu1 }
  0xb5   :  { %v170_v51 = vadd.f32 %v598_v50, %v169_v47 }
  0xd4   :  { %v189_v52 = vpop.f32.mrf.mxu1 }
  0xd5   :  { %v190_v53 = vadd.f32 %v189_v52, %v170_v51 }
  0xd7   :  { %v193_v54 = vmul.f32 0.01, %v190_v53  ;;  %vm192_vm0 = vcmp.gt.f32.partialorder %v190_v53, 0.0 }
  0xd9   :  { %v194_v55 = vsel %vm192_vm0, %v190_v53, %v193_v54 }
  0xda   :  { %v195_v56 = vpack.c.bf16 %v194_v55, %v194_v55 }
  0xdc   :  { %272 = vmatmul.bf16.vlgmr.msra.gmra.mxu2 %v195_v56 }
 0x15f   :  { %v273_v2 = vpop.f32.mrf.mxu2 }
 0x160   :  { %v274_v3 = vadd.f32 %v599_v1, %v273_v2 }
 0x162   :  { %v278_v4 = vmul.f32 0.01, %v274_v3  ;;  %vm277_vm1 = vcmp.gt.f32.partialorder %v274_v3, 0.0 }
 0x164   :  { %v279_v5 = vsel %vm277_vm1, %v274_v3, %v278_v4 }
 0x165   :  { %v280_v6 = vpack.c.bf16 %v279_v5, %v279_v5 }
 0x167   :  { %v275_v7 = vpop.f32.mrf.mxu2  ;;  %357 = vmatmul.bf16.vlgmr.msra.gmra.mxu3 %v280_v6 }
 0x1ea   :  { %v358_v11 = vpop.f32.mrf.mxu3 }
 0x1eb   :  { %v359_v12 = vadd.f32 %v600_v10, %v358_v11 }
 0x1ed   :  { %v363_v13 = vmul.f32 0.01, %v359_v12  ;;  %vm362_vm2 = vcmp.gt.f32.partialorder %v359_v12, 0.0 }
 0x1ef   :  { %v364_v14 = vsel %vm362_vm2, %v359_v12, %v363_v13 }
 0x1f0   :  { %v365_v15 = vpack.c.bf16 %v364_v14, %v364_v14 }
 0x1f2   :  { %v360_v16 = vpop.f32.mrf.mxu3  ;;  %442 = vmatmul.bf16.vlgmr.msra.gmra.mxu0 %v365_v15 }
 0x26f   :  { %v443_v18 = vpop.f32.mrf.mxu0 }
 0x270   :  { %v444_v19 = vadd.f32 %v601_v17, %v443_v18 }
 0x272   :  { %v447_v20 = vpack.c.bf16 %v444_v19, %v444_v19 }
 0x274   :  { %448 = vst [vmem:[#allocation11] sm:$0x1] %v447_v20 }
 0x275   :  { %459 = dma.vmem_to_hbm [thread:$0]  %s455_s19, 16, %s457_s22, [#allocation4]  }
 0x277   :  { %v445_v21 = vpop.f32.mrf.mxu0 }
 0x278   :  { %752 = dma.done.wait [#allocation4], 16  }
 0x279   :  { %753 = vsyncadd [#allocation4], 4294967280 }
 0x27a   :  { %464 = vsyncpa [#allocation3], 1 }
 0x27b   :  { %465 = vsyncpa [#allocation6], 1 }
 0x27c   :  { %466 = vsyncpa [#allocation9], 1 }
 0x27d   :  { %467 = vsyncpa [#allocation4], 1 }

</bundles_post_ra>
